<compile_context>
chip_gen: v6e
topology: v6e:2x2x1
jax: 0.10.0
libtpu: 0.0.40
codegen_flags: <defaults>
</compile_context>

<pallas_src>
import functools

import numpy as np
import jax
import jax.numpy as jnp
from jax import lax
from jax.experimental import pallas as pl
from jax.experimental.pallas import tpu as pltpu


# ------------------------------ fused kernel ------------------------------- #

def _block_kernel(x_ref, w1_ref, w2c_ref, b1_ref, bsum_ref, mask_ref, *rest,
                  H, W, downsample, G):
    # x_ref:    (1, Cin, H*W)          compact NCHW image (flat spatial on lanes)
    # w1_ref:   (Cmid, 9*Cin)          conv1, taps stacked into K
    # w2c_ref:  (Cout, 9*Cmid + Cin)   conv2 taps stacked into K, 1x1 shortcut appended
    # b1_ref:   (Cmid, 1)  f32         conv1 bias
    # bsum_ref: (Cout, 1)  f32         conv2 bias + shortcut bias
    # mask_ref: (2, H*W)               row0: zero where w==0 (dw=-1); row1: zero where w==W-1 (dw=+1)
    # pool_ref: (2*G*W, G*W2) f32      (downsample only) fused 2x2-avg + compaction matrix
    # o_ref:    (1, Cout, HWout)
    # scratch:  xp (Cin, HW+2Q), h1p (Cmid, HW+2Q), x9 (9*Cin, HW), h9 (9*Cmid+Cin, HW)
    if downsample:
        pool_ref = rest[0]
        o_ref, xp_ref, h1p_ref, x9_ref, h9_ref = rest[1:]
    else:
        pool_ref = None
        o_ref, xp_ref, h1p_ref, x9_ref, h9_ref = rest

    f32 = jnp.float32
    HW = H * W
    Q = W + 1                                   # one-side row-pad width
    Cin = x_ref.shape[1]
    Cmid = w1_ref.shape[0]
    Cout = w2c_ref.shape[0]

    taps = [(dh * W + dw, dw) for dh in (-1, 0, 1) for dw in (-1, 0, 1)]

    # dw boundary masks, hoisted to the wrapper; two tiny loads here.
    m_left = mask_ref[0:1, :]                   # kill wrapped reads for dw = -1
    m_right = mask_ref[1:2, :]                  # kill wrapped reads for dw = +1

    # ---- stage 0: row-padded input source (one lane-dense interior store) -----
    # Pads are re-zeroed every step (tiny (C, W+1) stores) so scratch carries no
    # cross-step state: safe under megacore "parallel" batch splitting.
    xc = x_ref[0].astype(xp_ref.dtype)          # in-kernel cast (bf16 path)
    xp_ref[:, 0:Q] = jnp.zeros((Cin, Q), xp_ref.dtype)
    xp_ref[:, Q + HW:] = jnp.zeros((Cin, Q), xp_ref.dtype)
    xp_ref[:, Q:Q + HW] = xc

    # ---- build stacked conv1 operand (K = 9*Cin), full-width writes -----------
    for k, (s, dw) in enumerate(taps):
        slab = xp_ref[:, Q + s:Q + s + HW]
        if dw < 0:
            slab = slab * m_left
        elif dw > 0:
            slab = slab * m_right
        x9_ref[k * Cin:(k + 1) * Cin, :] = slab

    # ---- conv1: ONE MXU matmul, f32 accumulate, bias + ReLU in f32 ------------
    h1 = jnp.dot(w1_ref[...], x9_ref[...], preferred_element_type=f32)
    h1 = jnp.maximum(h1 + b1_ref[...], 0.0)     # (Cmid, HW) f32

    # ---- row-padded conv1 activation source ------------------------------------
    h1p_ref[:, 0:Q] = jnp.zeros((Cmid, Q), h1p_ref.dtype)
    h1p_ref[:, Q + HW:] = jnp.zeros((Cmid, Q), h1p_ref.dtype)
    h1p_ref[:, Q:Q + HW] = h1.astype(h1p_ref.dtype)

    # ---- stacked conv2 + shortcut operand (K = 9*Cmid + Cin) ------------------
    for k, (s, dw) in enumerate(taps):
        slab = h1p_ref[:, Q + s:Q + s + HW]
        if dw < 0:
            slab = slab * m_left
        elif dw > 0:
            slab = slab * m_right
        h9_ref[k * Cmid:(k + 1) * Cmid, :] = slab
    h9_ref[9 * Cmid:9 * Cmid + Cin, :] = xc     # 1x1 shortcut rides the same matmul

    # ---- conv2 + shortcut: ONE MXU matmul + fused biases -----------------------
    full = jnp.dot(w2c_ref[...], h9_ref[...], preferred_element_type=f32)
    full = full + bsum_ref[...]                 # (Cout, HW) f32

    # ---- epilogue ---------------------------------------------------------------
    if not downsample:
        o_ref[0, :, :] = full.astype(o_ref.dtype)          # single lane-dense store
    else:
        H2, W2 = H // 2, W // 2
        # Pooling commutes with the (linear) 1x1 shortcut, so pool the fused sum.
        # Each matmul consumes 2*G image rows and emits G pooled rows at once;
        # the 0.25 scale and vertical pair-add live inside pool_ref.
        for g in range(H2 // G):
            slab = full[:, 2 * g * G * W:2 * (g + 1) * G * W]      # (Cout, 2*G*W)
            pooled = jnp.dot(slab, pool_ref[...], preferred_element_type=f32)
            o_ref[0, :, g * G * W2:(g + 1) * G * W2] = pooled.astype(o_ref.dtype)


# ------------------------------- wrapper helpers ----------------------------- #

def _vmem_limit_bytes():
    try:
        cap = int(pltpu.get_tpu_info().vmem_capacity_bytes)
        return max(32 * 1024 * 1024, min(cap * 3 // 4, 100 * 1024 * 1024))
    except Exception:
        return 32 * 1024 * 1024


def _dw_masks(H, W, dtype):
    w = np.arange(H * W) % W
    left = (w != 0).astype(np.float32)          # neighbor w-1 exists
    right = (w != W - 1).astype(np.float32)     # neighbor w+1 exists
    return jnp.asarray(np.stack([left, right], axis=0), dtype=dtype)


def _choose_pool_rows(H2, W2):
    # Smallest divisor G of H2 with >=128 output lanes per pooled matmul; else
    # pool the whole image with a single matmul.
    for g in range(1, H2 + 1):
        if H2 % g == 0 and g * W2 >= 128:
            return g
    return H2


def _pool_matrix(W, G, W2):
    rows, cols = 2 * G * W, G * W2
    r = np.arange(rows) // W
    w = np.arange(rows) % W
    orow = np.arange(cols) // W2
    w2 = np.arange(cols) % W2
    P = (r[:, None] // 2 == orow[None, :]) & (w[:, None] // 2 == w2[None, :])
    return jnp.asarray(0.25 * P.astype(np.float32))


def prepare_params(params, compute_dtype=jnp.bfloat16):
    """One-time weight repack: torch OIHW -> K-stacked matmul operands."""
    w1, b1 = params["w1"], params["b1"]
    w2, b2 = params["w2"], params["b2"]
    wsc, bsc = params["wsc"], params["bsc"]
    Cmid, Cin = w1.shape[0], w1.shape[1]
    Cout = w2.shape[0]
    # row block k = kh*3+kw of the stacked operand holds that tap's Cin channels
    w1p = jnp.transpose(w1, (0, 2, 3, 1)).reshape(Cmid, 9 * Cin)
    w2p = jnp.transpose(w2, (0, 2, 3, 1)).reshape(Cout, 9 * Cmid)
    wscp = wsc.reshape(Cout, Cin)
    w2cat = jnp.concatenate([w2p, wscp], axis=1)          # conv2 || shortcut
    return {
        "w1": w1p.astype(compute_dtype),
        "w2cat": w2cat.astype(compute_dtype),
        "b1": b1.reshape(Cmid, 1).astype(jnp.float32),
        "bsum": (b2 + bsc).reshape(Cout, 1).astype(jnp.float32),
        "compute_dtype": compute_dtype,
    }


def optimized_block_forward(x_nchw, prepared, downsample):
    N, Cin, H, W = x_nchw.shape
    assert H % 2 == 0 and W % 2 == 0, "even spatial dims required for avg_pool2d(2)"
    cdt = prepared["compute_dtype"]
    Cmid = prepared["w1"].shape[0]
    Cout = prepared["w2cat"].shape[0]
    HW = H * W
    Q = W + 1
    Ho, Wo = (H // 2, W // 2) if downsample else (H, W)
    HWout = Ho * Wo

    x_flat = x_nchw.reshape(N, Cin, HW)         # no wrapper-side dtype cast

    masks = _dw_masks(H, W, cdt)
    inputs = [x_flat, prepared["w1"], prepared["w2cat"],
              prepared["b1"], prepared["bsum"], masks]
    in_specs = [
        pl.BlockSpec((1, Cin, HW), lambda n: (n, 0, 0)),
        pl.BlockSpec((Cmid, 9 * Cin), lambda n: (0, 0)),
        pl.BlockSpec((Cout, 9 * Cmid + Cin), lambda n: (0, 0)),
        pl.BlockSpec((Cmid, 1), lambda n: (0, 0)),
        pl.BlockSpec((Cout, 1), lambda n: (0, 0)),
        pl.BlockSpec((2, HW), lambda n: (0, 0)),
    ]
    G = 1
    if downsample:
        G = _choose_pool_rows(Ho, Wo)
        pool = _pool_matrix(W, G, Wo)
        inputs.append(pool)
        in_specs.append(pl.BlockSpec((2 * G * W, G * Wo), lambda n: (0, 0)))

    kernel = functools.partial(_block_kernel, H=H, W=W,
                               downsample=downsample, G=G)
    out = pl.pallas_call(
        kernel,
        out_shape=jax.ShapeDtypeStruct((N, Cout, HWout), x_nchw.dtype),
        grid=(N,),
        in_specs=in_specs,
        out_specs=pl.BlockSpec((1, Cout, HWout), lambda n: (n, 0, 0)),
        scratch_shapes=[
            pltpu.VMEM((Cin, HW + 2 * Q), cdt),            # row-padded input
            pltpu.VMEM((Cmid, HW + 2 * Q), cdt),           # row-padded conv1 act
            pltpu.VMEM((9 * Cin, HW), cdt),                # stacked conv1 operand
            pltpu.VMEM((9 * Cmid + Cin, HW), cdt),         # stacked conv2+sc operand
        ],
        compiler_params=pltpu.CompilerParams(
            dimension_semantics=("parallel",),
            vmem_limit_bytes=_vmem_limit_bytes()),
    )(*inputs)

    return out.reshape(N, Cout, Ho, Wo)


# ------------------- spectral norm (parameter preprocessing) ---------------- #

def _l2n(v, eps):
    return v / (jnp.linalg.norm(v) + eps)


def spectral_normalize(w, key, n_iter=1, eps=1e-4):
    # Mimics torch spectral_norm forward: power iteration, sigma = u^T W v.
    w_mat = w.reshape(w.shape[0], -1)
    u = _l2n(jax.random.normal(key, (w_mat.shape[0],), dtype=w.dtype), eps)
    v = _l2n(w_mat.T @ u, eps)
    for _ in range(n_iter - 1):
        u = _l2n(w_mat @ v, eps)
        v = _l2n(w_mat.T @ u, eps)
    u = _l2n(w_mat @ v, eps)
    sigma = u @ (w_mat @ v)
    return w / sigma


# ------------------------------ pure-JAX reference -------------------------- #

def ref_forward(x, params, downsample):
    def conv(x, w, b, pad):
        y = lax.conv_general_dilated(x, w, (1, 1), [(pad, pad), (pad, pad)],
                                     dimension_numbers=("NCHW", "OIHW", "NCHW"))
        return y + b[None, :, None, None]

    def pool(x):
        N, C, H, W = x.shape
        return x.reshape(N, C, H // 2, 2, W // 2, 2).mean(axis=(3, 5))

    h = jax.nn.relu(conv(x, params["w1"], params["b1"], 1))
    h = conv(h, params["w2"], params["b2"], 1)
    if downsample:
        h = pool(h)
        xs = pool(x)
    else:
        xs = x
    return h + conv(xs, params["wsc"], params["bsc"], 0)


# ------------------------------------ main ----------------------------------- #

if __name__ == "__main__":
    N, in_ch, out_ch, H, W = 2, 4, 8, 16, 16

    key = jax.random.PRNGKey(0)
    ks = jax.random.split(key, 10)
    x = jax.random.normal(ks[0], (N, in_ch, H, W), jnp.float32)

    w1 = jax.random.normal(ks[1], (out_ch, in_ch, 3, 3), jnp.float32) * 0.1
    b1 = jax.random.normal(ks[2], (out_ch,), jnp.float32) * 0.1
    w2 = jax.random.normal(ks[3], (out_ch, out_ch, 3, 3), jnp.float32) * 0.1
    b2 = jax.random.normal(ks[4], (out_ch,), jnp.float32) * 0.1
    wsc = jax.random.normal(ks[5], (out_ch, in_ch, 1, 1), jnp.float32) * 0.1
    bsc = jax.random.normal(ks[6], (out_ch,), jnp.float32) * 0.1

    params = {
        "w1": spectral_normalize(w1, ks[7]), "b1": b1,
        "w2": spectral_normalize(w2, ks[8]), "b2": b2,
        "wsc": spectral_normalize(wsc, ks[9]), "bsc": bsc,
    }

    # f32 operands (tight tolerance)
    prepared_f32 = prepare_params(params, jnp.float32)
    for downsample in (False, True):
        out = optimized_block_forward(x, prepared_f32, downsample)
        jax.block_until_ready(out)
        ref = ref_forward(x, params, downsample)
        assert out.shape == ref.shape, (out.shape, ref.shape)
        assert jnp.allclose(out, ref, rtol=1e-2, atol=1e-2), (
            "f32", downsample, float(jnp.max(jnp.abs(out - ref))))

    # bf16 MXU operands / bf16 activations, f32 accumulation (default fast path)
    prepared_bf16 = prepare_params(params)          # bf16 by default
    for downsample in (False, True):
        out = optimized_block_forward(x, prepared_bf16, downsample)
        jax.block_until_ready(out)
        ref = ref_forward(x, params, downsample)
        assert out.dtype == jnp.float32
        assert jnp.allclose(out, ref, rtol=1e-1, atol=1e-1), (
            "bf16", downsample, float(jnp.max(jnp.abs(out - ref))))

    print("KERNEL_OK")
</pallas_src>

<mosaic_0001>
module attributes {stable_mosaic.version = 11 : i64} {
  func.func @_block_kernel(%arg0: i32, %arg1: memref<1x4x256xf32, #tpu.memory_space<vmem>>, %arg2: memref<8x36xf32, #tpu.memory_space<vmem>>, %arg3: memref<8x76xf32, #tpu.memory_space<vmem>>, %arg4: memref<8x1xf32, #tpu.memory_space<vmem>>, %arg5: memref<8x1xf32, #tpu.memory_space<vmem>>, %arg6: memref<2x256xf32, #tpu.memory_space<vmem>>, %arg7: memref<1x8x256xf32, #tpu.memory_space<vmem>>, %arg8: memref<4x290xf32, #tpu.memory_space<vmem>>, %arg9: memref<8x290xf32, #tpu.memory_space<vmem>>, %arg10: memref<36x256xf32, #tpu.memory_space<vmem>>, %arg11: memref<76x256xf32, #tpu.memory_space<vmem>>) attributes {dimension_semantics = [#tpu.dimension_semantics<parallel>], iteration_bounds = array<i64: 2>, scalar_prefetch = 0 : i64, scratch_operands = 4 : i64, tpu.core_type = #tpu.core_type<tc>, window_params = [{transform_indices = @transform_0, window_bounds = array<i64: 1, 4, 256>}, {pipeline_mode = #tpu.pipeline_mode<synchronous>, transform_indices = @transform_1, window_bounds = array<i64: 8, 36>}, {pipeline_mode = #tpu.pipeline_mode<synchronous>, transform_indices = @transform_2, window_bounds = array<i64: 8, 76>}, {pipeline_mode = #tpu.pipeline_mode<synchronous>, transform_indices = @transform_3, window_bounds = array<i64: 8, 1>}, {pipeline_mode = #tpu.pipeline_mode<synchronous>, transform_indices = @transform_4, window_bounds = array<i64: 8, 1>}, {pipeline_mode = #tpu.pipeline_mode<synchronous>, transform_indices = @transform_5, window_bounds = array<i64: 2, 256>}, {transform_indices = @transform_6, window_bounds = array<i64: 1, 8, 256>}]} {
    %c0 = arith.constant 0 : index
    %c0_0 = arith.constant 0 : index
    %0 = vector.load %arg6[%c0, %c0_0] : memref<2x256xf32, #tpu.memory_space<vmem>>, vector<1x256xf32>
    %c1 = arith.constant 1 : index
    %c0_1 = arith.constant 0 : index
    %1 = vector.load %arg6[%c1, %c0_1] : memref<2x256xf32, #tpu.memory_space<vmem>>, vector<1x256xf32>
    %c0_2 = arith.constant 0 : index
    %c0_3 = arith.constant 0 : index
    %c0_4 = arith.constant 0 : index
    %2 = vector.load %arg1[%c0_2, %c0_3, %c0_4] : memref<1x4x256xf32, #tpu.memory_space<vmem>>, vector<1x4x256xf32>
    %3 = vector.shape_cast %2 : vector<1x4x256xf32> to vector<4x256xf32>
    %cst = arith.constant 0.000000e+00 : f32
    %4 = vector.broadcast %cst : f32 to vector<4x17xf32>
    %c0_5 = arith.constant 0 : index
    %c0_6 = arith.constant 0 : index
    %5 = vector.load %arg8[%c0_5, %c0_6] : memref<4x290xf32, #tpu.memory_space<vmem>>, vector<4x17xf32>
    tpu.vector_store %arg8[%c0_5, %c0_6], %4 {strides = array<i32>} : memref<4x290xf32, #tpu.memory_space<vmem>>, vector<4x17xf32>,
    %cst_7 = arith.constant 0.000000e+00 : f32
    %6 = vector.broadcast %cst_7 : f32 to vector<4x17xf32>
    %c0_8 = arith.constant 0 : index
    %c273 = arith.constant 273 : index
    %7 = vector.load %arg8[%c0_8, %c273] : memref<4x290xf32, #tpu.memory_space<vmem>>, vector<4x17xf32>
    tpu.vector_store %arg8[%c0_8, %c273], %6 {strides = array<i32>} : memref<4x290xf32, #tpu.memory_space<vmem>>, vector<4x17xf32>,
    %c0_9 = arith.constant 0 : index
    %c17 = arith.constant 17 : index
    %8 = vector.load %arg8[%c0_9, %c17] : memref<4x290xf32, #tpu.memory_space<vmem>>, vector<4x256xf32>
    tpu.vector_store %arg8[%c0_9, %c17], %3 {strides = array<i32>} : memref<4x290xf32, #tpu.memory_space<vmem>>, vector<4x256xf32>,
    %c0_10 = arith.constant 0 : index
    %c0_11 = arith.constant 0 : index
    %9 = vector.load %arg8[%c0_10, %c0_11] : memref<4x290xf32, #tpu.memory_space<vmem>>, vector<4x256xf32>
    %10 = vector.broadcast %0 : vector<1x256xf32> to vector<4x256xf32>
    %11 = arith.mulf %9, %10 : vector<4x256xf32>
    %c0_12 = arith.constant 0 : index
    %c0_13 = arith.constant 0 : index
    %12 = vector.load %arg10[%c0_12, %c0_13] : memref<36x256xf32, #tpu.memory_space<vmem>>, vector<4x256xf32>
    tpu.vector_store %arg10[%c0_12, %c0_13], %11 {strides = array<i32>} : memref<36x256xf32, #tpu.memory_space<vmem>>, vector<4x256xf32>,
    %c0_14 = arith.constant 0 : index
    %c1_15 = arith.constant 1 : index
    %13 = vector.load %arg8[%c0_14, %c1_15] : memref<4x290xf32, #tpu.memory_space<vmem>>, vector<4x256xf32>
    %c4 = arith.constant 4 : index
    %c0_16 = arith.constant 0 : index
    %14 = vector.load %arg10[%c4, %c0_16] : memref<36x256xf32, #tpu.memory_space<vmem>>, vector<4x256xf32>
    tpu.vector_store %arg10[%c4, %c0_16], %13 {strides = array<i32>} : memref<36x256xf32, #tpu.memory_space<vmem>>, vector<4x256xf32>,
    %c0_17 = arith.constant 0 : index
    %c2 = arith.constant 2 : index
    %15 = vector.load %arg8[%c0_17, %c2] : memref<4x290xf32, #tpu.memory_space<vmem>>, vector<4x256xf32>
    %16 = vector.broadcast %1 : vector<1x256xf32> to vector<4x256xf32>
    %17 = arith.mulf %15, %16 : vector<4x256xf32>
    %c8 = arith.constant 8 : index
    %c0_18 = arith.constant 0 : index
    %18 = vector.load %arg10[%c8, %c0_18] : memref<36x256xf32, #tpu.memory_space<vmem>>, vector<4x256xf32>
    tpu.vector_store %arg10[%c8, %c0_18], %17 {strides = array<i32>} : memref<36x256xf32, #tpu.memory_space<vmem>>, vector<4x256xf32>,
    %c0_19 = arith.constant 0 : index
    %c16 = arith.constant 16 : index
    %19 = vector.load %arg8[%c0_19, %c16] : memref<4x290xf32, #tpu.memory_space<vmem>>, vector<4x256xf32>
    %20 = vector.broadcast %0 : vector<1x256xf32> to vector<4x256xf32>
    %21 = arith.mulf %19, %20 : vector<4x256xf32>
    %c12 = arith.constant 12 : index
    %c0_20 = arith.constant 0 : index
    %22 = vector.load %arg10[%c12, %c0_20] : memref<36x256xf32, #tpu.memory_space<vmem>>, vector<4x256xf32>
    tpu.vector_store %arg10[%c12, %c0_20], %21 {strides = array<i32>} : memref<36x256xf32, #tpu.memory_space<vmem>>, vector<4x256xf32>,
    %c0_21 = arith.constant 0 : index
    %c17_22 = arith.constant 17 : index
    %23 = vector.load %arg8[%c0_21, %c17_22] : memref<4x290xf32, #tpu.memory_space<vmem>>, vector<4x256xf32>
    %c16_23 = arith.constant 16 : index
    %c0_24 = arith.constant 0 : index
    %24 = vector.load %arg10[%c16_23, %c0_24] : memref<36x256xf32, #tpu.memory_space<vmem>>, vector<4x256xf32>
    tpu.vector_store %arg10[%c16_23, %c0_24], %23 {strides = array<i32>} : memref<36x256xf32, #tpu.memory_space<vmem>>, vector<4x256xf32>,
    %c0_25 = arith.constant 0 : index
    %c18 = arith.constant 18 : index
    %25 = vector.load %arg8[%c0_25, %c18] : memref<4x290xf32, #tpu.memory_space<vmem>>, vector<4x256xf32>
    %26 = vector.broadcast %1 : vector<1x256xf32> to vector<4x256xf32>
    %27 = arith.mulf %25, %26 : vector<4x256xf32>
    %c20 = arith.constant 20 : index
    %c0_26 = arith.constant 0 : index
    %28 = vector.load %arg10[%c20, %c0_26] : memref<36x256xf32, #tpu.memory_space<vmem>>, vector<4x256xf32>
    tpu.vector_store %arg10[%c20, %c0_26], %27 {strides = array<i32>} : memref<36x256xf32, #tpu.memory_space<vmem>>, vector<4x256xf32>,
    %c0_27 = arith.constant 0 : index
    %c32 = arith.constant 32 : index
    %29 = vector.load %arg8[%c0_27, %c32] : memref<4x290xf32, #tpu.memory_space<vmem>>, vector<4x256xf32>
    %30 = vector.broadcast %0 : vector<1x256xf32> to vector<4x256xf32>
    %31 = arith.mulf %29, %30 : vector<4x256xf32>
    %c24 = arith.constant 24 : index
    %c0_28 = arith.constant 0 : index
    %32 = vector.load %arg10[%c24, %c0_28] : memref<36x256xf32, #tpu.memory_space<vmem>>, vector<4x256xf32>
    tpu.vector_store %arg10[%c24, %c0_28], %31 {strides = array<i32>} : memref<36x256xf32, #tpu.memory_space<vmem>>, vector<4x256xf32>,
    %c0_29 = arith.constant 0 : index
    %c33 = arith.constant 33 : index
    %33 = vector.load %arg8[%c0_29, %c33] : memref<4x290xf32, #tpu.memory_space<vmem>>, vector<4x256xf32>
    %c28 = arith.constant 28 : index
    %c0_30 = arith.constant 0 : index
    %34 = vector.load %arg10[%c28, %c0_30] : memref<36x256xf32, #tpu.memory_space<vmem>>, vector<4x256xf32>
    tpu.vector_store %arg10[%c28, %c0_30], %33 {strides = array<i32>} : memref<36x256xf32, #tpu.memory_space<vmem>>, vector<4x256xf32>,
    %c0_31 = arith.constant 0 : index
    %c34 = arith.constant 34 : index
    %35 = vector.load %arg8[%c0_31, %c34] : memref<4x290xf32, #tpu.memory_space<vmem>>, vector<4x256xf32>
    %36 = vector.broadcast %1 : vector<1x256xf32> to vector<4x256xf32>
    %37 = arith.mulf %35, %36 : vector<4x256xf32>
    %c32_32 = arith.constant 32 : index
    %c0_33 = arith.constant 0 : index
    %38 = vector.load %arg10[%c32_32, %c0_33] : memref<36x256xf32, #tpu.memory_space<vmem>>, vector<4x256xf32>
    tpu.vector_store %arg10[%c32_32, %c0_33], %37 {strides = array<i32>} : memref<36x256xf32, #tpu.memory_space<vmem>>, vector<4x256xf32>,
    %c0_34 = arith.constant 0 : index
    %c0_35 = arith.constant 0 : index
    %39 = vector.load %arg2[%c0_34, %c0_35] : memref<8x36xf32, #tpu.memory_space<vmem>>, vector<8x36xf32>
    %c0_36 = arith.constant 0 : index
    %c0_37 = arith.constant 0 : index
    %40 = vector.load %arg10[%c0_36, %c0_37] : memref<36x256xf32, #tpu.memory_space<vmem>>, vector<36x256xf32>
    %cst_38 = arith.constant dense<0.000000e+00> : vector<8x256xf32>
    %41 = tpu.matmul %39, %40, %cst_38 {dimension_numbers = #tpu.dot_dimension_numbers<[1], [0], [0], [1], [0, 0, 1, 1], [], []>} : vector<8x36xf32>, vector<36x256xf32>, vector<8x256xf32> -> vector<8x256xf32>
    %c0_39 = arith.constant 0 : index
    %c0_40 = arith.constant 0 : index
    %42 = vector.load %arg4[%c0_39, %c0_40] : memref<8x1xf32, #tpu.memory_space<vmem>>, vector<8x1xf32>
    %43 = vector.broadcast %42 : vector<8x1xf32> to vector<8x256xf32>
    %44 = arith.addf %41, %43 : vector<8x256xf32>
    %cst_41 = arith.constant 0.000000e+00 : f32
    %45 = vector.broadcast %cst_41 : f32 to vector<8x256xf32>
    %46 = arith.maximumf %44, %45 : vector<8x256xf32>
    %cst_42 = arith.constant 0.000000e+00 : f32
    %47 = vector.broadcast %cst_42 : f32 to vector<8x17xf32>
    %c0_43 = arith.constant 0 : index
    %c0_44 = arith.constant 0 : index
    %48 = vector.load %arg9[%c0_43, %c0_44] : memref<8x290xf32, #tpu.memory_space<vmem>>, vector<8x17xf32>
    tpu.vector_store %arg9[%c0_43, %c0_44], %47 {strides = array<i32>} : memref<8x290xf32, #tpu.memory_space<vmem>>, vector<8x17xf32>,
    %cst_45 = arith.constant 0.000000e+00 : f32
    %49 = vector.broadcast %cst_45 : f32 to vector<8x17xf32>
    %c0_46 = arith.constant 0 : index
    %c273_47 = arith.constant 273 : index
    %50 = vector.load %arg9[%c0_46, %c273_47] : memref<8x290xf32, #tpu.memory_space<vmem>>, vector<8x17xf32>
    tpu.vector_store %arg9[%c0_46, %c273_47], %49 {strides = array<i32>} : memref<8x290xf32, #tpu.memory_space<vmem>>, vector<8x17xf32>,
    %c0_48 = arith.constant 0 : index
    %c17_49 = arith.constant 17 : index
    %51 = vector.load %arg9[%c0_48, %c17_49] : memref<8x290xf32, #tpu.memory_space<vmem>>, vector<8x256xf32>
    tpu.vector_store %arg9[%c0_48, %c17_49], %46 {strides = array<i32>} : memref<8x290xf32, #tpu.memory_space<vmem>>, vector<8x256xf32>,
    %c0_50 = arith.constant 0 : index
    %c0_51 = arith.constant 0 : index
    %52 = vector.load %arg9[%c0_50, %c0_51] : memref<8x290xf32, #tpu.memory_space<vmem>>, vector<8x256xf32>
    %53 = vector.broadcast %0 : vector<1x256xf32> to vector<8x256xf32>
    %54 = arith.mulf %52, %53 : vector<8x256xf32>
    %c0_52 = arith.constant 0 : index
    %c0_53 = arith.constant 0 : index
    %55 = vector.load %arg11[%c0_52, %c0_53] : memref<76x256xf32, #tpu.memory_space<vmem>>, vector<8x256xf32>
    tpu.vector_store %arg11[%c0_52, %c0_53], %54 {strides = array<i32>} : memref<76x256xf32, #tpu.memory_space<vmem>>, vector<8x256xf32>,
    %c0_54 = arith.constant 0 : index
    %c1_55 = arith.constant 1 : index
    %56 = vector.load %arg9[%c0_54, %c1_55] : memref<8x290xf32, #tpu.memory_space<vmem>>, vector<8x256xf32>
    %c8_56 = arith.constant 8 : index
    %c0_57 = arith.constant 0 : index
    %57 = vector.load %arg11[%c8_56, %c0_57] : memref<76x256xf32, #tpu.memory_space<vmem>>, vector<8x256xf32>
    tpu.vector_store %arg11[%c8_56, %c0_57], %56 {strides = array<i32>} : memref<76x256xf32, #tpu.memory_space<vmem>>, vector<8x256xf32>,
    %c0_58 = arith.constant 0 : index
    %c2_59 = arith.constant 2 : index
    %58 = vector.load %arg9[%c0_58, %c2_59] : memref<8x290xf32, #tpu.memory_space<vmem>>, vector<8x256xf32>
    %59 = vector.broadcast %1 : vector<1x256xf32> to vector<8x256xf32>
    %60 = arith.mulf %58, %59 : vector<8x256xf32>
    %c16_60 = arith.constant 16 : index
    %c0_61 = arith.constant 0 : index
    %61 = vector.load %arg11[%c16_60, %c0_61] : memref<76x256xf32, #tpu.memory_space<vmem>>, vector<8x256xf32>
    tpu.vector_store %arg11[%c16_60, %c0_61], %60 {strides = array<i32>} : memref<76x256xf32, #tpu.memory_space<vmem>>, vector<8x256xf32>,
    %c0_62 = arith.constant 0 : index
    %c16_63 = arith.constant 16 : index
    %62 = vector.load %arg9[%c0_62, %c16_63] : memref<8x290xf32, #tpu.memory_space<vmem>>, vector<8x256xf32>
    %63 = vector.broadcast %0 : vector<1x256xf32> to vector<8x256xf32>
    %64 = arith.mulf %62, %63 : vector<8x256xf32>
    %c24_64 = arith.constant 24 : index
    %c0_65 = arith.constant 0 : index
    %65 = vector.load %arg11[%c24_64, %c0_65] : memref<76x256xf32, #tpu.memory_space<vmem>>, vector<8x256xf32>
    tpu.vector_store %arg11[%c24_64, %c0_65], %64 {strides = array<i32>} : memref<76x256xf32, #tpu.memory_space<vmem>>, vector<8x256xf32>,
    %c0_66 = arith.constant 0 : index
    %c17_67 = arith.constant 17 : index
    %66 = vector.load %arg9[%c0_66, %c17_67] : memref<8x290xf32, #tpu.memory_space<vmem>>, vector<8x256xf32>
    %c32_68 = arith.constant 32 : index
    %c0_69 = arith.constant 0 : index
    %67 = vector.load %arg11[%c32_68, %c0_69] : memref<76x256xf32, #tpu.memory_space<vmem>>, vector<8x256xf32>
    tpu.vector_store %arg11[%c32_68, %c0_69], %66 {strides = array<i32>} : memref<76x256xf32, #tpu.memory_space<vmem>>, vector<8x256xf32>,
    %c0_70 = arith.constant 0 : index
    %c18_71 = arith.constant 18 : index
    %68 = vector.load %arg9[%c0_70, %c18_71] : memref<8x290xf32, #tpu.memory_space<vmem>>, vector<8x256xf32>
    %69 = vector.broadcast %1 : vector<1x256xf32> to vector<8x256xf32>
    %70 = arith.mulf %68, %69 : vector<8x256xf32>
    %c40 = arith.constant 40 : index
    %c0_72 = arith.constant 0 : index
    %71 = vector.load %arg11[%c40, %c0_72] : memref<76x256xf32, #tpu.memory_space<vmem>>, vector<8x256xf32>
    tpu.vector_store %arg11[%c40, %c0_72], %70 {strides = array<i32>} : memref<76x256xf32, #tpu.memory_space<vmem>>, vector<8x256xf32>,
    %c0_73 = arith.constant 0 : index
    %c32_74 = arith.constant 32 : index
    %72 = vector.load %arg9[%c0_73, %c32_74] : memref<8x290xf32, #tpu.memory_space<vmem>>, vector<8x256xf32>
    %73 = vector.broadcast %0 : vector<1x256xf32> to vector<8x256xf32>
    %74 = arith.mulf %72, %73 : vector<8x256xf32>
    %c48 = arith.constant 48 : index
    %c0_75 = arith.constant 0 : index
    %75 = vector.load %arg11[%c48, %c0_75] : memref<76x256xf32, #tpu.memory_space<vmem>>, vector<8x256xf32>
    tpu.vector_store %arg11[%c48, %c0_75], %74 {strides = array<i32>} : memref<76x256xf32, #tpu.memory_space<vmem>>, vector<8x256xf32>,
    %c0_76 = arith.constant 0 : index
    %c33_77 = arith.constant 33 : index
    %76 = vector.load %arg9[%c0_76, %c33_77] : memref<8x290xf32, #tpu.memory_space<vmem>>, vector<8x256xf32>
    %c56 = arith.constant 56 : index
    %c0_78 = arith.constant 0 : index
    %77 = vector.load %arg11[%c56, %c0_78] : memref<76x256xf32, #tpu.memory_space<vmem>>, vector<8x256xf32>
    tpu.vector_store %arg11[%c56, %c0_78], %76 {strides = array<i32>} : memref<76x256xf32, #tpu.memory_space<vmem>>, vector<8x256xf32>,
    %c0_79 = arith.constant 0 : index
    %c34_80 = arith.constant 34 : index
    %78 = vector.load %arg9[%c0_79, %c34_80] : memref<8x290xf32, #tpu.memory_space<vmem>>, vector<8x256xf32>
    %79 = vector.broadcast %1 : vector<1x256xf32> to vector<8x256xf32>
    %80 = arith.mulf %78, %79 : vector<8x256xf32>
    %c64 = arith.constant 64 : index
    %c0_81 = arith.constant 0 : index
    %81 = vector.load %arg11[%c64, %c0_81] : memref<76x256xf32, #tpu.memory_space<vmem>>, vector<8x256xf32>
    tpu.vector_store %arg11[%c64, %c0_81], %80 {strides = array<i32>} : memref<76x256xf32, #tpu.memory_space<vmem>>, vector<8x256xf32>,
    %c72 = arith.constant 72 : index
    %c0_82 = arith.constant 0 : index
    %82 = vector.load %arg11[%c72, %c0_82] : memref<76x256xf32, #tpu.memory_space<vmem>>, vector<4x256xf32>
    tpu.vector_store %arg11[%c72, %c0_82], %3 {strides = array<i32>} : memref<76x256xf32, #tpu.memory_space<vmem>>, vector<4x256xf32>,
    %c0_83 = arith.constant 0 : index
    %c0_84 = arith.constant 0 : index
    %83 = vector.load %arg3[%c0_83, %c0_84] : memref<8x76xf32, #tpu.memory_space<vmem>>, vector<8x76xf32>
    %c0_85 = arith.constant 0 : index
    %c0_86 = arith.constant 0 : index
    %84 = vector.load %arg11[%c0_85, %c0_86] : memref<76x256xf32, #tpu.memory_space<vmem>>, vector<76x256xf32>
    %cst_87 = arith.constant dense<0.000000e+00> : vector<8x256xf32>
    %85 = tpu.matmul %83, %84, %cst_87 {dimension_numbers = #tpu.dot_dimension_numbers<[1], [0], [0], [1], [0, 0, 1, 1], [], []>} : vector<8x76xf32>, vector<76x256xf32>, vector<8x256xf32> -> vector<8x256xf32>
    %c0_88 = arith.constant 0 : index
    %c0_89 = arith.constant 0 : index
    %86 = vector.load %arg5[%c0_88, %c0_89] : memref<8x1xf32, #tpu.memory_space<vmem>>, vector<8x1xf32>
    %87 = vector.broadcast %86 : vector<8x1xf32> to vector<8x256xf32>
    %88 = arith.addf %85, %87 : vector<8x256xf32>
    %c0_90 = arith.constant 0 : index
    %c0_91 = arith.constant 0 : index
    %c0_92 = arith.constant 0 : index
    %89 = vector.load %arg7[%c0_90, %c0_91, %c0_92] : memref<1x8x256xf32, #tpu.memory_space<vmem>>, vector<1x8x256xf32>
    %90 = vector.shape_cast %89 : vector<1x8x256xf32> to vector<8x256xf32>
    %91 = vector.shape_cast %88 : vector<8x256xf32> to vector<1x8x256xf32>
    tpu.vector_store %arg7[%c0_90, %c0_91, %c0_92], %91 {strides = array<i32>} : memref<1x8x256xf32, #tpu.memory_space<vmem>>, vector<1x8x256xf32>,
    return
  }
  func.func @transform_0(%arg0: i32) -> (i32, i32, i32) {
    %c0_i32 = arith.constant 0 : i32
    %c0_i32_0 = arith.constant 0 : i32
    %c0_i32_1 = arith.constant 0 : i32
    return %arg0, %c0_i32, %c0_i32_0 : i32, i32, i32
  }
  func.func @transform_1(%arg0: i32) -> (i32, i32) {
    %c0_i32 = arith.constant 0 : i32
    %c0_i32_0 = arith.constant 0 : i32
    %c0_i32_1 = arith.constant 0 : i32
    return %c0_i32, %c0_i32_0 : i32, i32
  }
  func.func @transform_2(%arg0: i32) -> (i32, i32) {
    %c0_i32 = arith.constant 0 : i32
    %c0_i32_0 = arith.constant 0 : i32
    %c0_i32_1 = arith.constant 0 : i32
    return %c0_i32, %c0_i32_0 : i32, i32
  }
  func.func @transform_3(%arg0: i32) -> (i32, i32) {
    %c0_i32 = arith.constant 0 : i32
    %c0_i32_0 = arith.constant 0 : i32
    %c0_i32_1 = arith.constant 0 : i32
    return %c0_i32, %c0_i32_0 : i32, i32
  }
  func.func @transform_4(%arg0: i32) -> (i32, i32) {
    %c0_i32 = arith.constant 0 : i32
    %c0_i32_0 = arith.constant 0 : i32
    %c0_i32_1 = arith.constant 0 : i32
    return %c0_i32, %c0_i32_0 : i32, i32
  }
  func.func @transform_5(%arg0: i32) -> (i32, i32) {
    %c0_i32 = arith.constant 0 : i32
    %c0_i32_0 = arith.constant 0 : i32
    %c0_i32_1 = arith.constant 0 : i32
    return %c0_i32, %c0_i32_0 : i32, i32
  }
  func.func @transform_6(%arg0: i32) -> (i32, i32, i32) {
    %c0_i32 = arith.constant 0 : i32
    %c0_i32_0 = arith.constant 0 : i32
    %c0_i32_1 = arith.constant 0 : i32
    return %arg0, %c0_i32, %c0_i32_0 : i32, i32, i32
  }
}

</mosaic_0001>

<bundles_post_ra>
// kernel: tpu_custom_call.1
= control target key start
LH: loop header
LB: loop body
LE: loop exit
PB: predicated region body
PF: predicated region fallthrough
CT: control target
= control target key end

     0   :  { %11 = vsyncpa [#allocation7], 0  ;;  %s1643_s0 = inlined_call_operand.vmem [shape: f32[2,4,256], index: 0, kind: input, shape index: {}]   ;;  %s1644_s1 = inlined_call_operand.hbm [shape: f32[8,36], index: 1, kind: input, shape index: {}]   ;;  %s1645_s2 = inlined_call_operand.hbm [shape: f32[8,76], index: 2, kind: input, shape index: {}]   ;;  %s1646_s3 = inlined_call_operand.vmem [shape: f32[8,1], index: 3, kind: input, shape index: {}]   ;;  %s1647_s4 = inlined_call_operand.vmem [shape: f32[8,1], index: 4, kind: input, shape index: {}]   ;;  %s1648_s5 = inlined_call_operand.vmem [shape: f32[2,256], index: 5, kind: input, shape index: {}]   ;;  %s1649_s6 = inlined_call_operand.hbm [shape: f32[2,8,256], index: 6, kind: output, shape index: {}]  }
   0x1   :  { %12 = vsyncpa [#allocation10], 0 }
   0x2   :  { %13 = vsyncpa [#allocation8], 0 }
   0x3   :  { %15 = vsyncpa [#allocation8 + $0x1], 0  ;;  %s1334_s21 = smov 0   ;;  %s1336_s22 = smov 0  }
   0x4   :  { %s1338_s23 = smov 0   ;;  %s1340_s24 = smov 0  }
   0x5 LB: > { %s1355_s25 = sadd.s32 4294967295, %s1278_s24   ;;  %s1053_s26 = sadd.s32 4294967294, %s1278_s24   ;;  %s1278_s24 = sphi %s1340_s24, %s1673_s24   ;;  %s1274_s23 = sphi %s1338_s23, %s1672_s23   ;;  %s1270_s22 = sphi %s1336_s22, %s1671_s22   ;;  %s1266_s21 = sphi %s1334_s21, %s1670_s21  }
   0x6   : > { %s1359_s27 = sadd.s32 1, %s1278_s24   ;;  %s159_s28 = sadd.s32 1, %s1274_s23 }
   0x7   : > { %s156_s29 = ssub.s32 %s1278_s24, %s1359_s27  ;;  %p169_p0 = scmp.ne.s32.totalorder %s1274_s23, %s1270_s22 }
   0x8   : > { %p157_p1 = scmp.eq.s32.totalorder %s156_s29, 0  ;;  %p170_p2 = scmp.eq.s32.totalorder %s1355_s25, 1 }
   0x9   : > { %p175_p3 = scmp.ne.s32.totalorder %s1270_s22, %s1266_s21  ;;  %p176_p4 = scmp.eq.s32.totalorder %s1053_s26, 1 }
   0xa   : > { %s1370_s30 = scalar_select %p157_p1, %s1274_s23, %s159_s28  }
   0xb   : > { %p1372_p5 = por %p170_p2, %p169_p0  ;;  %p1376_p6 = por %p176_p4, %p175_p3 }
   0xc   : > { %p1054_p7 = scmp.ge.s32.totalorder %s1278_s24, 1  ;;  %p183_p8 = scmp.lt.s32.totalorder %s1278_s24, 3 }
   0xd   : > { %s1656_s7 = scalar_select %p1372_p5, 1, 0 }
   0xe   : > { %s1657_s8 = scalar_select %p1376_p6, 1, 0 }
   0xf   : > { %p1650_p9 = scmp.eq.s32.totalorder %s1355_s25, 0  ;;  %p1383_p10 = pnand %p1054_p7, %p183_p8 }
  0x10   : > { %s1280_s10 = smov [#allocation6]   ;;  %s1281_s12 = smov [#allocation9]  }
  0x11   : > { %s1658_s9 = scalar_select %p1383_p10, 1, 0 }
  0x12   : > { %s196_s11 = sshll.u32 %s1280_s10, 4  ;;  %p1088_p11 = pneg %p1383_p10  ;;  %s197_s11 = int_to_ptr.vmem [resolvable:$true] %s196_s11 }
  0x13   : > { %s207_s13 = sshll.u32 %s1281_s12, 4  ;;  %s1169_s15 = scalar_lea.vmem %s197_s11, 128  ;;  %s208_s13 = int_to_ptr.vmem [resolvable:$true] %s207_s13 }
  0x14   : > { %p1391_p12 = pnand %p1650_p9, %p1088_p11  ;;  %p1170_p0 = scmp.ne.s32.totalorder %s197_s11, %s1169_s15 }
  0x15   : > { %p1177_p3 = scmp.lt.s32.totalorder %s197_s11, %s197_s11  ;;  %p1178_p4 = scmp.lt.s32.totalorder %s1169_s15, %s1169_s15 }
  0x16   : > { %p1160_p13 = pneg %p1391_p12 }
  0x17   : > { %p1179_p7 = por %p1178_p4, %p1177_p3 }
  0x18   : > { %p1172_p1 = pnand %p1170_p0, %p1160_p13 }
  0x1a   : > { %p1173_p2 = pneg %p1172_p1 }
  0x1c   : > { %p1180_p8 = pnand %p1179_p7, %p1173_p2 }
  0x1e   : > { %1183 = shalt.err (!%p1180_p8)
}
  0x1f   : > { %1091 = dma.hbm_to_vmem [thread:$0]  (!%p1391_p12), %s1644_s1, 128, %s197_s11, [#allocation7]  }
  0x20   : > { %s1195_s18 = scalar_lea.vmem %s208_s13, 128  ;;  %p1203_p0 = scmp.lt.s32.totalorder %s208_s13, %s208_s13 }
  0x21   : > { %p1196_p11 = scmp.ne.s32.totalorder %s208_s13, %s1195_s18  ;;  %p1204_p1 = scmp.lt.s32.totalorder %s1195_s18, %s1195_s18 }
  0x23   : > { %p1198_p9 = pnand %p1196_p11, %p1160_p13  ;;  %p1205_p5 = por %p1204_p1, %p1203_p0 }
  0x25   : > { %p1199_p6 = pneg %p1198_p9 }
  0x27   : > { %p1206_p10 = pnand %p1205_p5, %p1199_p6 }
  0x29   : > { %1209 = shalt.err (!%p1206_p10)
}
  0x2a   : > { %1094 = dma.hbm_to_vmem [thread:$0]  (!%p1391_p12), %s1645_s2, 128, %s208_s13, [#allocation10]  }
  0x2b   : > { %p1660_p2 = scmp.ne.s32.totalorder %s1658_s9, 0 }
  0x2c   : > { %p1661_p3 = scmp.eq.s32.totalorder (!%p1660_p2), %s1355_s25, 0 }
  0x2d   : > { %237 = sbr.rel (%p1660_p2) target bundleno = 1051 (0x41b), region = 44 }
  0x32   : > { %1253 = dma.done.wait (%p1661_p3), [#allocation7], 128   ;;  %p1662_p13 = pmov %p1661_p3 }
  0x33   : > { %p1663_p9 = pmov %p1661_p3 }
  0x34   : > { %1255 = vsyncadd (%p1662_p13), [#allocation7], 4294967168 }
  0x35   : > { %1257 = dma.done.wait (%p1663_p9), [#allocation10], 128   ;;  %p1664_p5 = pmov %p1661_p3 }
  0x36   : > { %p271_p6 = scmp.lt.s32.totalorder %s1355_s25, 1  ;;  %v299_v0 = vlaneseq  ;;  %vm280_vm0 = vcmask 134144   ;;  %v1282_v1 = vmov 0.0   ;;  %vm282_vm1 = vcmask 273544   ;;  %s1283_s13 = smov 17  }
  0x37   : > { %1259 = vsyncadd (%p1664_p5), [#allocation10], 4294967168  ;;  %281 = vst.msk [vmem:[#allocation2] sm:$0xf] %vm280_vm0, %v1282_v1  ;;  %vm288_vm2 = vcmask 138240   ;;  %610 = vmatprep.mubr.f32.mxu0 %v1282_v1  ;;  %948 = vmatprep.mubr.f32.mxu1 %v1282_v1  ;;  %s1284_s16 = smov 34  }
  0x38   : > { %s272_s26 = scalar_select %p271_p6, %s1355_s25, 1  ;;  %v300_v2 = vshrl.u32 %v299_v0, 7  ;;  %283 = vst.msk [vmem:[#allocation2 + $0x8] sm:$0xf] %vm282_vm1, %v1282_v1  ;;  %vm292_vm3 = vcmask 1043592   ;;  %vm293_vm4 = vcmask 1047556  }
  0x39   : > { %619 = vst.msk [vmem:[#allocation3] sm:$0xff] %vm288_vm2, %v1282_v1  ;;  %v1064_v6 = vld [vmem:[%s1648_s5 + $0x1] ss:$2 sm:$0x3]  ;;  %s1285_s17 = smov 32   ;;  %s1286_s18 = smov 2   ;;  %vm294_vm5 = vmor %vm293_vm4, %vm292_vm3 }
  0x3a   : > { %s1076_s28 = sshll.u32 %s272_s26, 3  ;;  %v301_v3 = vsub.s32 0, %v300_v2  ;;  %v305_v4 = vsub.s32 1, %v300_v2  ;;  %v276_v10 = vld [vmem:[%s1648_s5] ss:$2 sm:$0x3] }
  0x3b   : > { %s275_s10 = scalar_lea.vmem %s1643_s0, %s1076_s28  ;;  %s1287_s19 = smov 18   ;;  %vm496_vm6 = vcmask 277504   ;;  %vm450_vm7 = vcmask 261120   ;;  %vm422_vm8 = vcmask 146432   ;;  %vm376_vm9 = vcmask 130048   ;;  %v529_v0 = vld [vmem:[%s1646_s3] sm:$0xff] }
  0x3c   : > { %v279_v5 = vld [vmem:[%s275_s10] sm:$0xff]  ;;  %v1439_v8 = vrot.slane %v1064_v6, %v301_v3  ;;  %v1441_v9 = vrot.slane %v1064_v6, %v305_v4  ;;  %v1446_v11 = vrot.slane %v276_v10, %v301_v3  ;;  %v1448_v12 = vrot.slane %v276_v10, %v305_v4  ;;  %s1288_s20 = smov 16   ;;  %s1289_s26 = smov 111  }
  0x3d   : > { %285 = vrot.lane.b32.xlu0 %v279_v5, %s1283_s13  ;;  %v843_v7 = vcombine.high %v279_v5, %v279_v5  ;;  %845 = vst [vmem:[#allocation5 + $0x90] sm:$0xf] %v279_v5  ;;  %s1290_s28 = smov 95   ;;  %s1291_s29 = smov 96   ;;  %vm349_vm10 = vcmask 15360   ;;  %v1297_v63 = vmov 0  }
  0x3e   : > { %v345_v13 = vcombine.low %v1439_v8, %v1441_v9  ;;  %v307_v14 = vcombine.low %v1446_v11, %v1448_v12  ;;  %s1292_s9 = smov 127   ;;  %s1293_s10 = smov 126   ;;  %1154 = vset.pattern.permute.xlu0 %v1297_v63  ;;  %vm484_vm11 = vcmask 777216   ;;  %vm410_vm12 = vcmask 908288  }
  0x3f   : > { %846 = vst [vmem:[#allocation5 + $0x98] sm:$0xf] %v843_v7  ;;  %s1653_s11 = smov 94   ;;  %s1295_s12 = smov 110   ;;  %vm438_vm13 = vcmask 900096   ;;  %vm392_vm14 = vcmask 916480  }
  0x40   : > { %447 = vrot.lane.b32.xlu1 %v307_v14, %s1285_s17  ;;  %s1296_s14 = smov 112   ;;  %vm511_vm15 = vcmask 769024   ;;  %vm364_vm1 = vcmask 1031168   ;;  %vm539_vm3 = vcmask 1043456   ;;  %vm1655_vm4 = vcmask 1039360   ;;  %p1668_p12 = scmp.ne.s32.totalorder %s1656_s7, 0 }
  0x41   : > { %493 = vrot.lane.b32.xlu0 %v345_v13, %s1284_s16 }
  0x44   : > { %419 = vrot.lane.b32.xlu1 %v345_v13, %s1287_s19 }
  0x45   : > { %346 = vrot.lane.b32.xlu0 %v345_v13, %s1286_s18 }
  0x48   : > { %373 = vrot.lane.b32.xlu1 %v307_v14, %s1288_s20 }
  0xaf   : > { %v286_v15 = vpop.permute.xlu0 %285 }
  0xb0   : > { %v287_v16 = vrot.slane %v286_v15, 4 }
  0xb2   : > { %v289_v17 = vsel %vm288_vm2, %v287_v16, %v286_v15  ;;  %296 = vst.msk [vmem:[#allocation2 + $0x8] sm:$0xf] %vm280_vm0, %v287_v16  ;;  %v448_v19 = vpop.permute.xlu1 %447  ;;  %vm465_vm0 = vcmask 785408  }
  0xb3   : > { %295 = vst.msk [vmem:[#allocation2] sm:$0xff] %vm294_vm5, %v289_v17  ;;  %v494_v18 = vpop.permute.xlu0 %493  ;;  %v449_v20 = vrot.slane %v448_v19, 4  ;;  %vm535_vm5 = vcmask 293888  }
  0xb4   : > { %v495_v28 = vrot.slane %v494_v18, 4 }
  0xb5   : > { %v451_v37 = vsel %vm450_vm7, %v449_v20, %v448_v19 }
  0xb6   : > { %v420_v33 = vpop.permute.xlu1 %419  ;;  %v497_v36 = vsel %vm496_vm6, %v495_v28, %v494_v18 }
  0xb7   : > { %v347_v26 = vpop.permute.xlu0 %346  ;;  %v421_v40 = vrot.slane %v420_v33, 4 }
  0xb8   : > { %v348_v29 = vrot.slane %v347_v26, 4 }
  0xb9   : > { %v446_v22 = vld [vmem:[#allocation2 + $0x8] sm:$0xf]  ;;  %v423_v47 = vsel %vm422_vm8, %v421_v40, %v420_v33 }
  0xba   : > { %v1461_v21 = vld [vmem:[#allocation2] sm:$0xff]  ;;  %v400_v23 = vld [vmem:[#allocation2 + $0x8] sm:$0xf]  ;;  %v455_v25 = vmul.f32 %v449_v20, %v446_v22  ;;  %v374_v42 = vpop.permute.xlu1 %373  ;;  %v350_v55 = vsel %vm349_vm10, %v348_v29, %v347_v26 }
  0xbb   : > { %408 = vrot.lane.b32.xlu0 %v400_v23, %s1289_s26  ;;  %480 = vrot.lane.b32.xlu1 %v1461_v21, %s1290_s28  ;;  %v309_v24 = vmul.f32 %v307_v14, %v1461_v21  ;;  %v1156_v30 = vld [vmem:[#allocation2 + $0x8] ss:$0 sps:$4 sm:$0xff]   ;;  %v500_v38 = vmul.f32 %v497_v36, %v1461_v21  ;;  %v454_v39 = vmul.f32 %v451_v37, %v1461_v21  ;;  %v375_v45 = vrot.slane %v374_v42, 4 }
  0xbc   : > { %v492_v31 = vld [vmem:[#allocation2 + $0x8] sm:$0xf]  ;;  %v476_v44 = vcombine.low %v1461_v21, %v1461_v21  ;;  %v403_v46 = vcombine.high %v1461_v21, %v1461_v21  ;;  %v426_v49 = vmul.f32 %v423_v47, %v1461_v21  ;;  %v353_v56 = vmul.f32 %v350_v55, %v1461_v21  ;;  %v518_v55 = vld [vmem:[#allocation6] sm:$0xff] }
  0xbd   : > { %v311_v27 = vcombine.high %v309_v24, %v309_v24  ;;  %313 = vst [vmem:[#allocation4 + $0x30] sm:$0xf] %v309_v24  ;;  %v335_v32 = vld [vmem:[#allocation2 + $0x8] sm:$0xf]  ;;  %v501_v34 = vmul.f32 %v495_v28, %v492_v31  ;;  %v377_v52 = vsel %vm376_vm9, %v375_v45, %v374_v42  ;;  %v504_v57 = vcombine.high %v500_v38, %v500_v38 }
  0xbe   : > { %v354_v35 = vmul.f32 %v348_v29, %v335_v32  ;;  %v418_v41 = vld [vmem:[#allocation2 + $0x8] sm:$0xf]  ;;  %v380_v53 = vmul.f32 %v377_v52, %v1461_v21  ;;  %v430_v58 = vcombine.low %v426_v49, %v426_v49  ;;  %v458_v59 = vcombine.high %v454_v39, %v454_v39 }
  0xbf   : > { %463 = vrot.lane.b32.xlu0 %v455_v25, %s1291_s29  ;;  %404 = vrot.lane.b32.xlu1 %v1461_v21, %s1289_s26  ;;  %314 = vst [vmem:[#allocation4] sm:$0xf] %v311_v27  ;;  %v427_v43 = vmul.f32 %v421_v40, %v418_v41  ;;  %v372_v48 = vld [vmem:[#allocation2 + $0x8] sm:$0xf]  ;;  %v357_v61 = vcombine.high %v353_v56, %v353_v56 }
  0xc0   : > { %v381_v50 = vmul.f32 %v375_v45, %v372_v48  ;;  %v384_v60 = vcombine.low %v380_v53, %v380_v53  ;;  %v1157_v62 = vld [vmem:[#allocation2 + $0x8] ss:$0 sps:$4 sm:$0xff]  }
  0xc1   : > { %v431_v51 = vcombine.low %v427_v43, %v427_v43 }
  0xc2   : > { %v385_v54 = vcombine.low %v381_v50, %v381_v50 }
  0xc3   : > { %482 = vrot.lane.b32.xlu0 %v1156_v30, %s1290_s28  ;;  %323 = vrot.lane.b32.xlu1 %v1461_v21, %s1292_s9 }
  0xc7   : > { %362 = vrot.lane.b32.xlu0 %v354_v35, %s1293_s10  ;;  %509 = vrot.lane.b32.xlu1 %v501_v34, %s1653_s11 }
  0xcb   : > { %505 = vrot.lane.b32.xlu0 %v500_v38, %s1653_s11  ;;  %459 = vrot.lane.b32.xlu1 %v454_v39, %s1291_s29 }
  0xcf   : > { %478 = vrot.lane.b32.xlu0 %v476_v44, %s1290_s28  ;;  %406 = vrot.lane.b32.xlu1 %v403_v46, %s1289_s26 }
  0xd3   : > { %436 = vrot.lane.b32.xlu0 %v431_v51, %s1295_s12  ;;  %434 = vrot.lane.b32.xlu1 %v426_v49, %s1295_s12 }
  0xd7   : > { %390 = vrot.lane.b32.xlu0 %v385_v54, %s1296_s14  ;;  %388 = vrot.lane.b32.xlu1 %v380_v53, %s1296_s14 }
  0xdb   : > { %507 = vrot.lane.b32.xlu0 %v504_v57, %s1653_s11  ;;  %358 = vrot.lane.b32.xlu1 %v353_v56, %s1293_s10 }
  0xdf   : > { %432 = vrot.lane.b32.xlu0 %v430_v58, %s1295_s12  ;;  %461 = vrot.lane.b32.xlu1 %v458_v59, %s1291_s29 }
  0xe3   : > { %386 = vrot.lane.b32.xlu0 %v384_v60, %s1296_s14  ;;  %360 = vrot.lane.b32.xlu1 %v357_v61, %s1293_s10 }
  0xe7   : > { %325 = vrot.lane.b32.xlu0 %v1157_v62, %s1292_s9  ;;  %321 = vrot.lane.b32.xlu1 %v476_v44, %s1292_s9 }
  0xeb   : > { %532 = vperm.xlu0 %1154, %v529_v0  }
  0xef   : > { %817 = vrot.lane.b32.xlu0 %v1439_v8, %s1284_s16 }
  0xf3   : > { %770 = vrot.lane.b32.xlu0 %v1446_v11, %s1285_s17 }
  0xf7   : > { %741 = vrot.lane.b32.xlu0 %v1439_v8, %s1287_s19 }
  0xfb   : > { %694 = vrot.lane.b32.xlu0 %v1446_v11, %s1288_s20 }
  0xff   : > { %665 = vrot.lane.b32.xlu0 %v1439_v8, %s1286_s18 }
 0x12d   : > { %v409_v2 = vpop.permute.xlu0 %408  ;;  %v481_v3 = vpop.permute.xlu1 %480 }
 0x131   : > { %v464_v4 = vpop.permute.xlu0 %463  ;;  %v405_v5 = vpop.permute.xlu1 %404 }
 0x135   : > { %v483_v6 = vpop.permute.xlu0 %482  ;;  %v324_v7 = vpop.permute.xlu1 %323 }
 0x136   : > { %v486_v10 = vsel %vm484_vm11, %v481_v3, %v483_v6 }
 0x137   : > { %490 = vst [vmem:[#allocation4 + $0x20] sm:$0xf0] %v486_v10 }
 0x139   : > { %v363_v13 = vpop.permute.xlu0 %362  ;;  %v510_v14 = vpop.permute.xlu1 %509 }
 0x13d   : > { %v506_v15 = vpop.permute.xlu0 %505  ;;  %v460_v16 = vpop.permute.xlu1 %459 }
 0x141   : > { %v479_v17 = vpop.permute.xlu0 %478  ;;  %v407_v18 = vpop.permute.xlu1 %406 }
 0x142   : > { %v485_v19 = vsel %vm484_vm11, %v479_v17, %v481_v3  ;;  %v411_v8 = vsel %vm410_vm12, %v405_v5, %v407_v18  ;;  %v412_v20 = vsel %vm410_vm12, %v407_v18, %v409_v2 }
 0x143   : > { %489 = vst [vmem:[#allocation4 + $0x8] sm:$0xf0] %v485_v19  ;;  %415 = vst [vmem:[#allocation4 + $0x48] sm:$0xf] %v411_v8  ;;  %v866_v19 = vld [vmem:[#allocation5 + $0x90] sm:$0xf] }
 0x144   : > { %416 = vst [vmem:[#allocation4 + $0x28] sm:$0xf] %v412_v20 }
 0x145   : > { %v437_v21 = vpop.permute.xlu0 %436  ;;  %v435_v22 = vpop.permute.xlu1 %434 }
 0x146   : > { %v440_v23 = vsel %vm438_vm13, %v435_v22, %v437_v21 }
 0x147   : > { %444 = vst [vmem:[#allocation4 + $0x28] sm:$0xf0] %v440_v23 }
 0x149   : > { %v391_v24 = vpop.permute.xlu0 %390  ;;  %v389_v25 = vpop.permute.xlu1 %388 }
 0x14a   : > { %v394_v26 = vsel %vm392_vm14, %v389_v25, %v391_v24 }
 0x14b   : > { %398 = vst [vmem:[#allocation4 + $0x10] sm:$0xf0] %v394_v26 }
 0x14d   : > { %v508_v27 = vpop.permute.xlu0 %507  ;;  %v359_v28 = vpop.permute.xlu1 %358 }
 0x14e   : > { %v512_v29 = vsel %vm511_vm15, %v506_v15, %v508_v27  ;;  %v513_v30 = vsel %vm511_vm15, %v508_v27, %v510_v14  ;;  %v524_v49 = vld [vmem:[#allocation4 + $0x28] sm:$0xff] }
 0x14f   : > { %516 = vst [vmem:[#allocation4 + $0x40] sm:$0xf] %v512_v29  ;;  %517 = vst [vmem:[#allocation4 + $0x38] sm:$0xf] %v513_v30 }
 0x151   : > { %v433_v31 = vpop.permute.xlu0 %432  ;;  %v462_v32 = vpop.permute.xlu1 %461 }
 0x152   : > { %v439_v33 = vsel %vm438_vm13, %v433_v31, %v435_v22  ;;  %v466_v34 = vsel %vm465_vm0, %v460_v16, %v462_v32  ;;  %v467_v35 = vsel %vm465_vm0, %v462_v32, %v464_v4 }
 0x153   : > { %443 = vst [vmem:[#allocation4 + $0x48] sm:$0xf0] %v439_v33  ;;  %470 = vst [vmem:[#allocation4 + $0x8] sm:$0xf] %v466_v34 }
 0x154   : > { %471 = vst [vmem:[#allocation4 + $0x20] sm:$0xf] %v467_v35 }
 0x155   : > { %v387_v36 = vpop.permute.xlu0 %386  ;;  %v361_v37 = vpop.permute.xlu1 %360 }
 0x156   : > { %v393_v38 = vsel %vm392_vm14, %v387_v36, %v389_v25  ;;  %v365_v39 = vsel %vm364_vm1, %v359_v28, %v361_v37  ;;  %v366_v40 = vsel %vm364_vm1, %v361_v37, %v363_v13  ;;  %v528_v41 = vld [vmem:[#allocation4 + $0x38] sm:$0xf]  ;;  %v527_v42 = vld [vmem:[#allocation4 + $0x40] sm:$0xf] }
 0x157   : > { %397 = vst [vmem:[#allocation4 + $0x18] sm:$0xf0] %v393_v38  ;;  %369 = vst [vmem:[#allocation4 + $0x18] sm:$0xf] %v365_v39  ;;  %1065 = vmatprep.subr.msk.mxu0 %vm539_vm3, %v528_v41  ;;  %v868_v38 = vld [vmem:[%s1647_s4] sm:$0xff] }
 0x158   : > { %370 = vst [vmem:[#allocation4 + $0x10] sm:$0xf] %v366_v40  ;;  %1066 = vmatpush1.msk.msra.mxu0 %vm539_vm3, %v527_v42 }
 0x159   : > { %v326_v43 = vpop.permute.xlu0 %325  ;;  %v322_v44 = vpop.permute.xlu1 %321 }
 0x15a   : > { %v329_v45 = vsel %vm1655_vm4, %v324_v7, %v326_v43  ;;  %v328_v46 = vsel %vm1655_vm4, %v322_v44, %v324_v7  ;;  %v525_v48 = vld [vmem:[#allocation4 + $0x8] sm:$0xff]  ;;  %vm620_vm4 = vcmask 277640  }
 0x15b   : > { %v526_v47 = vld [vmem:[#allocation4 + $0x20] sm:$0xff]  ;;  %333 = vst [vmem:[#allocation4] sm:$0xf0] %v329_v45  ;;  %332 = vst [vmem:[#allocation4 + $0x30] sm:$0xf0] %v328_v46  ;;  %v523_v50 = vld [vmem:[#allocation4 + $0x48] sm:$0xff] }
 0x15c   : > { %570 = vmatprep.subr.mxu0 %v526_v47  ;;  %621 = vst.msk [vmem:[#allocation3 + $0x10] sm:$0xff] %vm620_vm4, %v1282_v1  ;;  %vm632_vm4 = vcmask 1047688  }
 0x15d   : > { %571 = vmatpush1.msra.mxu0 %v525_v48 }
 0x15e   : > { %572 = vmatprep.subr.mxu0 %v524_v49  ;;  %v521_v52 = vld [vmem:[#allocation4 + $0x18] sm:$0xff] }
 0x15f   : > { %573 = vmatpush1.msra.mxu0 %v523_v50  ;;  %v522_v51 = vld [vmem:[#allocation4 + $0x10] sm:$0xff] }
 0x160   : > { %574 = vmatprep.subr.mxu0 %v522_v51 }
 0x161   : > { %575 = vmatpush1.msra.mxu0 %v521_v52 }
 0x162   : > { %v520_v53 = vld [vmem:[#allocation4] sm:$0xff]  ;;  %v519_v54 = vld [vmem:[#allocation4 + $0x30] sm:$0xff] }
 0x163   : > { %576 = vmatprep.subr.mxu0 %v520_v53 }
 0x164   : > { %577 = vmatpush1.msra.mxu0 %v519_v54 }
 0x165   : > { %1067 = vmatmul.mubr.msk.f32.vlgmr.msra.gmra.mxu0 %vm535_vm5, %v518_v55 }
 0x166   : > { %v533_v56 = vpop.permute.xlu0 %532 }
 0x16a   : > { %v818_v1 = vpop.permute.xlu0 %817 }
 0x16e   : > { %v771_v0 = vpop.permute.xlu0 %770 }
 0x225   : > { %v612_v57 = vpop.f32.mrf.mxu0 }
 0x226   : > { %v613_v58 = vadd.f32 %v612_v57, %v533_v56 }
 0x227   : > { %v614_v59 = vpop.f32.mrf.mxu0 }
 0x228   : > { %v617_v60 = vmax.f32 %v613_v58, 0.0  ;;  %v615_v61 = vadd.f32 %v614_v59, %v533_v56 }
 0x22a   : > { %624 = vrot.lane.b32.xlu1 %v617_v60, %s1283_s13  ;;  %v618_v62 = vmax.f32 %v615_v61, 0.0 }
 0x22e   : > { %626 = vrot.lane.b32.xlu1 %v618_v62, %s1283_s13  ;;  %s1665_s13 = smov 94  }
 0x232   : > { %819 = vrot.lane.b32.xlu1 %v1441_v9, %s1284_s16 }
 0x236   : > { %772 = vrot.lane.b32.xlu1 %v1448_v12, %s1285_s17 }
 0x23a   : > { %743 = vrot.lane.b32.xlu1 %v1441_v9, %s1287_s19 }
 0x23e   : > { %696 = vrot.lane.b32.xlu1 %v1448_v12, %s1288_s20  ;;  %s1077_s20 = sshll.u32 %s1355_s25, 8 }
 0x242   : > { %667 = vrot.lane.b32.xlu1 %v1441_v9, %s1286_s18  ;;  %v742_v9 = vpop.permute.xlu0 %741  ;;  %s268_s18 = sand.u32 1, %s1270_s22  }
 0x243   : > { %s1061_s19 = sshll.u32 %s268_s18, 4  ;;  %s958_s11 = scalar_lea.sflag [#allocation8], %s268_s18 }
 0x29c   : > { %v625_v63 = vpop.permute.xlu1 %624 }
 0x29d   : > { %633 = vst.msk [vmem:[#allocation3] sm:$0xff] %vm632_vm4, %v625_v63 }
 0x2a0   : > { %v627_v2 = vpop.permute.xlu1 %626 }
 0x2a1   : > { %v628_v3 = vsel %vm288_vm2, %v625_v63, %v627_v2  ;;  %635 = vst.msk [vmem:[#allocation3 + $0x10] sm:$0xff] %vm288_vm2, %v627_v2  ;;  %vm1666_vm2 = vcmask 1039360  }
 0x2a2   : > { %v1552_v4 = vmul.f32 %v628_v3, %v1448_v12  ;;  %v695_v12 = vpop.permute.xlu0 %694 }
 0x2a4   : > { %v636_v5 = vld [vmem:[#allocation3] sm:$0xff]  ;;  %v820_v6 = vpop.permute.xlu1 %819 }
 0x2a5   : > { %802 = vrot.lane.b32.xlu1 %v636_v5, %s1290_s28  ;;  %726 = vrot.lane.b32.xlu0 %v636_v5, %s1289_s26  ;;  %v749_v7 = vmul.f32 %v742_v9, %v636_v5  ;;  %v825_v10 = vmul.f32 %v818_v1, %v636_v5  ;;  %v1557_v13 = vmul.f32 %v636_v5, %v1446_v11  ;;  %v867_v11 = vld [vmem:[#allocation5 + $0x98] sm:$0xf] }
 0x2a6   : > { %v702_v16 = vmul.f32 %v695_v12, %v636_v5  ;;  %v778_v17 = vmul.f32 %v771_v0, %v636_v5  ;;  %1068 = vmatprep.subr.msk.mxu1 %vm539_vm3, %v867_v11  ;;  %v821_v24 = vsel %vm496_vm6, %v818_v1, %v820_v6  ;;  %v666_v32 = vpop.permute.xlu0 %665  ;;  %vm1667_vm6 = vmmov %vm1666_vm2  ;;  %v847_v11 = vld [vmem:[#allocation9] sm:$0xff] }
 0x2a7   : > { %1069 = vmatpush1.msk.msra.mxu1 %vm539_vm3, %v866_v19  ;;  %v826_v26 = vmul.f32 %v821_v24, %v628_v3  ;;  %v673_v34 = vmul.f32 %v666_v32, %v636_v5 }
 0x2a8   : > { %v773_v14 = vpop.permute.xlu1 %772  ;;  %v816_v15 = vld [vmem:[#allocation3 + $0x10] sm:$0xff] }
 0x2a9   : > { %755 = vrot.lane.b32.xlu1 %v749_v7, %s1295_s12  ;;  %831 = vrot.lane.b32.xlu0 %v825_v10, %s1665_s13  ;;  %v827_v20 = vmul.f32 %v820_v6, %v816_v15  ;;  %v780_v22 = vmul.f32 %v816_v15, %v773_v14  ;;  %v774_v28 = vsel %vm450_vm7, %v771_v0, %v773_v14  ;;  %vm874_vm7 = vcmask 621568  }
 0x2aa   : > { %v779_v30 = vmul.f32 %v774_v28, %v628_v3 }
 0x2ac   : > { %v744_v18 = vpop.permute.xlu1 %743 }
 0x2ad   : > { %806 = vrot.lane.b32.xlu0 %v816_v15, %s1290_s28  ;;  %730 = vrot.lane.b32.xlu1 %v816_v15, %s1289_s26  ;;  %v751_v21 = vmul.f32 %v816_v15, %v744_v18  ;;  %v745_v29 = vsel %vm422_vm8, %v742_v9, %v744_v18 }
 0x2ae   : > { %v750_v31 = vmul.f32 %v745_v29, %v628_v3 }
 0x2b0   : > { %v697_v8 = vpop.permute.xlu1 %696 }
 0x2b1   : > { %784 = vrot.lane.b32.xlu0 %v778_v17, %s1291_s29  ;;  %708 = vrot.lane.b32.xlu1 %v702_v16, %s1296_s14  ;;  %v704_v23 = vmul.f32 %v816_v15, %v697_v8  ;;  %v698_v33 = vsel %vm376_vm9, %v695_v12, %v697_v8 }
 0x2b2   : > { %v703_v35 = vmul.f32 %v698_v33, %v628_v3 }
 0x2b4   : > { %v668_v25 = vpop.permute.xlu1 %667 }
 0x2b5   : > { %804 = vrot.lane.b32.xlu1 %v628_v3, %s1290_s28  ;;  %728 = vrot.lane.b32.xlu0 %v628_v3, %s1289_s26  ;;  %v675_v27 = vmul.f32 %v816_v15, %v668_v25  ;;  %v669_v36 = vsel %vm349_vm10, %v666_v32, %v668_v25  ;;  %s270_s26 = scalar_lea.vmem [#allocation11], %s1061_s19 }
 0x2b6   : > { %v674_v37 = vmul.f32 %v669_v36, %v628_v3  ;;  %s972_s28 = sshll.u32 %s270_s26, 4  ;;  %s973_s28 = int_to_ptr.vmem [resolvable:$true] %s972_s28 }
 0x2b9   : > { %835 = vrot.lane.b32.xlu1 %v827_v20, %s1665_s13  ;;  %759 = vrot.lane.b32.xlu0 %v751_v21, %s1295_s12 }
 0x2bd   : > { %788 = vrot.lane.b32.xlu1 %v780_v22, %s1291_s29  ;;  %712 = vrot.lane.b32.xlu0 %v704_v23, %s1296_s14 }
 0x2c1   : > { %833 = vrot.lane.b32.xlu0 %v826_v26, %s1665_s13  ;;  %683 = vrot.lane.b32.xlu1 %v675_v27, %s1293_s10 }
 0x2c5   : > { %786 = vrot.lane.b32.xlu0 %v779_v30, %s1291_s29  ;;  %757 = vrot.lane.b32.xlu1 %v750_v31, %s1295_s12  ;;  %s1210_s12 = scalar_lea.vmem %s973_s28, 256 }
 0x2c6   : > { %p1211_p10 = scmp.ne.s32.totalorder %s973_s28, %s1210_s12 }
 0x2c8   : > { %p1212_p4 = pnand %p1211_p10, %p1668_p12 }
 0x2c9   : > { %679 = vrot.lane.b32.xlu0 %v673_v34, %s1293_s10  ;;  %710 = vrot.lane.b32.xlu1 %v703_v35, %s1296_s14  ;;  %s1298_s14 = smov [#allocation11]  }
 0x2ca   : > { %p1213_p7 = pneg %p1212_p4  ;;  %s1214_s25 = sshll.u32 %s1298_s14, 4  ;;  %s1215_s25 = int_to_ptr.vmem [resolvable:$false] %s1214_s25 }
 0x2cb   : > { %s1216_s15 = scalar_lea.vmem %s1215_s25, 512  ;;  %p1217_p8 = scmp.lt.s32.totalorder %s973_s28, %s1215_s25 }
 0x2cc   : > { %p1218_p11 = scmp.lt.s32.totalorder %s1216_s15, %s1210_s12 }
 0x2cd   : > { %652 = vrot.lane.b32.xlu1 %v628_v3, %s1292_s9  ;;  %681 = vrot.lane.b32.xlu0 %v674_v37, %s1293_s10  ;;  %s970_s10 = scalar_lea.hbm %s1649_s6, %s1077_s20 }
 0x2ce   : > { %p1219_p0 = por %p1218_p11, %p1217_p8 }
 0x2d0   : > { %p1220_p1 = pnand %p1219_p0, %p1213_p7 }
 0x2d1   : > { %650 = vrot.lane.b32.xlu1 %v636_v5, %s1292_s9  ;;  %654 = vrot.lane.b32.xlu0 %v816_v15, %s1292_s9 }
 0x2d5   : > { %871 = vperm.xlu0 %1154, %v868_v38  }
 0x317   : > { %v727_v39 = vpop.permute.xlu0 %726  ;;  %v803_v40 = vpop.permute.xlu1 %802 }
 0x31b   : > { %v832_v41 = vpop.permute.xlu0 %831  ;;  %v756_v42 = vpop.permute.xlu1 %755 }
 0x31f   : > { %v807_v43 = vpop.permute.xlu0 %806  ;;  %v731_v44 = vpop.permute.xlu1 %730 }
 0x323   : > { %v785_v45 = vpop.permute.xlu0 %784  ;;  %v709_v46 = vpop.permute.xlu1 %708 }
 0x327   : > { %v729_v47 = vpop.permute.xlu0 %728  ;;  %v805_v48 = vpop.permute.xlu1 %804 }
 0x328   : > { %v732_v49 = vsel %vm410_vm12, %v727_v39, %v729_v47  ;;  %v733_v50 = vsel %vm410_vm12, %v729_v47, %v731_v44  ;;  %v808_v51 = vsel %vm484_vm11, %v803_v40, %v805_v48  ;;  %v809_v52 = vsel %vm484_vm11, %v805_v48, %v807_v43 }
 0x32b   : > { %v760_v53 = vpop.permute.xlu0 %759  ;;  %v836_v54 = vpop.permute.xlu1 %835 }
 0x32f   : > { %v713_v55 = vpop.permute.xlu0 %712  ;;  %v789_v56 = vpop.permute.xlu1 %788 }
 0x333   : > { %v834_v57 = vpop.permute.xlu0 %833  ;;  %v684_v58 = vpop.permute.xlu1 %683 }
 0x334   : > { %v837_v59 = vsel %vm511_vm15, %v832_v41, %v834_v57  ;;  %v838_v60 = vsel %vm511_vm15, %v834_v57, %v836_v54 }
 0x335   : > { %898 = vmatprep.subr.mxu1 %v838_v60 }
 0x336   : > { %899 = vmatpush1.msra.mxu1 %v837_v59 }
 0x337   : > { %v787_v61 = vpop.permute.xlu0 %786  ;;  %v758_v62 = vpop.permute.xlu1 %757  ;;  %900 = vmatprep.subr.mxu1 %v809_v52 }
 0x338   : > { %v790_v1 = vsel %vm465_vm0, %v785_v45, %v787_v61  ;;  %v791_v63 = vsel %vm465_vm0, %v787_v61, %v789_v56  ;;  %v761_v0 = vsel %vm438_vm13, %v756_v42, %v758_v62  ;;  %v762_v2 = vsel %vm438_vm13, %v758_v62, %v760_v53  ;;  %901 = vmatpush1.msra.mxu1 %v808_v51 }
 0x339   : > { %902 = vmatprep.subr.mxu1 %v791_v63 }
 0x33a   : > { %903 = vmatpush1.msra.mxu1 %v790_v1 }
 0x33b   : > { %v680_v3 = vpop.permute.xlu0 %679  ;;  %v711_v5 = vpop.permute.xlu1 %710  ;;  %904 = vmatprep.subr.mxu1 %v762_v2 }
 0x33c   : > { %v714_v6 = vsel %vm392_vm14, %v709_v46, %v711_v5  ;;  %v715_v9 = vsel %vm392_vm14, %v711_v5, %v713_v55  ;;  %905 = vmatpush1.msra.mxu1 %v761_v0 }
 0x33d   : > { %906 = vmatprep.subr.mxu1 %v733_v50 }
 0x33e   : > { %907 = vmatpush1.msra.mxu1 %v732_v49 }
 0x33f   : > { %v682_v7 = vpop.permute.xlu0 %681  ;;  %v653_v10 = vpop.permute.xlu1 %652  ;;  %908 = vmatprep.subr.mxu1 %v715_v9 }
 0x340   : > { %v685_v14 = vsel %vm364_vm1, %v680_v3, %v682_v7  ;;  %v686_v15 = vsel %vm364_vm1, %v682_v7, %v684_v58  ;;  %909 = vmatpush1.msra.mxu1 %v714_v6 }
 0x341   : > { %910 = vmatprep.subr.mxu1 %v686_v15 }
 0x342   : > { %911 = vmatpush1.msra.mxu1 %v685_v14 }
 0x343   : > { %v655_v12 = vpop.permute.xlu0 %654  ;;  %v651_v16 = vpop.permute.xlu1 %650 }
 0x344   : > { %v657_v17 = vsel %vm1666_vm2, %v653_v10, %v655_v12  ;;  %v656_v18 = vsel %vm1667_vm6, %v651_v16, %v653_v10 }
 0x345   : > { %912 = vmatprep.subr.mxu1 %v657_v17 }
 0x346   : > { %913 = vmatpush1.msra.mxu1 %v656_v18 }
 0x347   : > { %914 = vmatprep.subr.mxu1 %v1552_v4 }
 0x348   : > { %915 = vmatpush1.msra.mxu1 %v1557_v13 }
 0x349   : > { %1070 = vmatmul.mubr.msk.f32.vlgmr.msra.gmra.mxu1 %vm874_vm7, %v847_v11 }
 0x350   : > { %v872_v19 = vpop.permute.xlu0 %871 }
 0x409   : > { %v950_v8 = vpop.f32.mrf.mxu1 }
 0x40a   : > { %v951_v20 = vadd.f32 %v950_v8, %v872_v19 }
 0x40b   : > { %v952_v21 = vpop.f32.mrf.mxu1 }
 0x40c   : > { %955 = vst [vmem:[%s270_s26] sm:$0xff] %v951_v20  ;;  %v953_v22 = vadd.f32 %v952_v21, %v872_v19 }
 0x40e   : > { %956 = vst [vmem:[%s270_s26 + $0x8] sm:$0xff] %v953_v22 }
 0x40f   : > { %1223 = shalt.err (!%p1220_p1)
}
 0x410   : > { %s1224_s13 = scalar_lea.hbm %s970_s10, 256  ;;  %s1228_s18 = scalar_lea.hbm %s1649_s6, 512 }
 0x411   : > { %p1225_p2 = scmp.ne.s32.totalorder %s970_s10, %s1224_s13  ;;  %p1229_p9 = scmp.lt.s32.totalorder %s970_s10, %s1649_s6 }
 0x412   : > { %p1230_p5 = scmp.lt.s32.totalorder %s1228_s18, %s1224_s13 }
 0x413   : > { %p1226_p3 = pnand %p1225_p2, %p1668_p12 }
 0x414   : > { %p1231_p6 = por %p1230_p5, %p1229_p9 }
 0x415   : > { %p1227_p13 = pneg %p1226_p3 }
 0x417   : > { %p1232_p10 = pnand %p1231_p6, %p1227_p13 }
 0x419   : > { %1235 = shalt.err (!%p1232_p10)
}
 0x41a   : > { %1086 = dma.vmem_to_hbm [thread:$0]  (%p1668_p12), %s973_s28, 256, %s970_s10, %s958_s11  }
 0x41b PF: > { %p1103_p4 = scmp.ge.s32.totalorder %s1278_s24, 2  ;;  %s984_s26 = sand.u32 1, %s1266_s21  }
 0x41c   : > { %p1669_p7 = scmp.ne.s32.totalorder %s1657_s8, 0  ;;  %s985_s29 = scalar_lea.sflag [#allocation8], %s984_s26 }
 0x41e   : > { %p1096_p8 = pnand %p1103_p4, %p1669_p7 }
 0x420   : > { %p1097_p11 = pneg %p1096_p8 }
 0x422   : > { %1261 = dma.done.wait (%p1097_p11), %s985_s29, 256  }
 0x423   : > { %1263 = vsyncadd (%p1097_p11), %s985_s29, 4294967040  ;;  %p18_p0 = scmp.ge.s32.totalorder %s1359_s27, 4   ;;  %s1670_s21 = smov %s1270_s22 }
 0x424   : > { %s1671_s22 = smov %s1274_s23  ;;  %s1672_s23 = smov %s1370_s30 }
 0x425   : > { %s1673_s24 = smov %s1359_s27  ;;  %20 = sbr.rel (!%p18_p0) target bundleno = 5 (0x5), region = 89 }
 0x42a   :  { %990 = vsyncpa [#allocation7], 1 }
 0x42b   :  { %992 = vsyncpa [#allocation7 + $0x1], 1 }
 0x42c   :  { %993 = vsyncpa [#allocation10], 1 }
 0x42d   :  { %994 = vsyncpa [#allocation8], 1 }
 0x42e   :  { %996 = vsyncpa [#allocation8 + $0x1], 1 }

</bundles_post_ra>
